<compile_context>
chip_gen: v6e
topology: v6e:2x2x1
jax: 0.10.0
libtpu: 0.0.40
codegen_flags: <defaults>
</compile_context>

<pallas_src>
import functools

import jax
import jax.numpy as jnp
from jax.experimental import pallas as pl
from jax.experimental.pallas import tpu as pltpu

EPS = 1e-5  # nn.InstanceNorm2d default eps (affine=False, biased variance)


def _roll_lanes(x, s):
    """Cyclic lane shift: y[:, p] = x[:, (p + s) mod L]. Caller masks wrapped cols."""
    L = x.shape[-1]
    return pltpu.roll(x, shift=(-s) % L, axis=1)


def _conv_in_relu(x, wk, bias, mask_l, mask_r, mask_t, mask_b, W, HW, Bt,
                  compute_dtype):
    """One conv3x3(+bias) -> InstanceNorm(affine=False) -> ReLU pass.

    x    : (C, L) float32, L = Bt*HW; channels on sublanes, Bt images side by side
           on the lane axis.
    wk   : (C, 9C) weight in compute_dtype; column order (kh*3 + kw)*C + cin.
    bias : (C, 1) float32.
    masks: (1, L) bool, broadcast over sublanes; they zero both the conv "SAME"
           padding and every column/row a cyclic roll wraps in (incl. cross-image
           wraps when several images share the lane axis).
    """
    # Width taps (dw = -1 / 0 / +1). mask_l / mask_r zero the padding columns AND
    # the +/-1 lane-roll wrap (the wrapped position always has col 0 / W-1).
    xl = jnp.where(mask_l, _roll_lanes(x, -1), 0.0)      # y[p] = x[p-1]  (kw = 0)
    xr = jnp.where(mask_r, _roll_lanes(x, +1), 0.0)      # y[p] = x[p+1]  (kw = 2)
    mid = jnp.concatenate([xl, x, xr], axis=0)           # (3C, L), kw order 0,1,2

    # Height taps (dh = -1 / +1) of all three planes at once: one +/-W lane roll of
    # the stacked (3C, L) block, plus one top / one bottom mask.
    up = jnp.where(mask_t, _roll_lanes(mid, -W), 0.0)    # y[p] = x[p-W]  (kh = 0)
    dn = jnp.where(mask_b, _roll_lanes(mid, +W), 0.0)    # y[p] = x[p+W]  (kh = 2)

    taps = jnp.concatenate([up, mid, dn], axis=0)        # (9C, L), (kh*3+kw)*C+cin
    acc = jnp.dot(wk, taps.astype(compute_dtype),
                  preferred_element_type=jnp.float32)    # single MXU matmul
    acc = acc + bias                                     # (C,1) bcast over lanes

    # Segmented InstanceNorm (per image, per channel), one traversal:
    # sum and sum-of-squares together; var = E[x^2] - mean^2 (biased).
    inv_hw = jnp.float32(1.0 / HW)
    outs = []
    for b in range(Bt):
        seg = acc[:, b * HW:(b + 1) * HW] if Bt > 1 else acc   # 128-aligned slice
        s1 = jnp.sum(seg, axis=1, keepdims=True)
        s2 = jnp.sum(seg * seg, axis=1, keepdims=True)
        mean = s1 * inv_hw
        var = jnp.maximum(s2 * inv_hw - mean * mean, 0.0)
        y = (seg - mean) * jax.lax.rsqrt(var + EPS)
        outs.append(jnp.maximum(y, 0.0))                       # ReLU
    return outs[0] if Bt == 1 else jnp.concatenate(outs, axis=1)


def _convblock_kernel(x_ref, w_ref, b_ref, o_ref, *, H, W, Bt, compute_dtype):
    HW = H * W
    L = Bt * HW
    # Pack Bt images side by side on the lane axis (static, 128-aligned concat).
    if Bt > 1:
        x = jnp.concatenate([x_ref[0, b].astype(jnp.float32) for b in range(Bt)],
                            axis=1)
    else:
        x = x_ref[0, 0].astype(jnp.float32)

    # (1, L) boundary masks, sublane-broadcast in the selects below.
    pos = jax.lax.broadcasted_iota(jnp.int32, (1, L), 1)
    col = pos % W               # column within a row (HW and L are multiples of W)
    q = pos % HW                # flat position within one image
    mask_l = col >= 1           # valid source for dw = -1
    mask_r = col < (W - 1)      # valid source for dw = +1
    mask_t = q >= W             # valid source for dh = -1
    mask_b = q < (HW - W)       # valid source for dh = +1

    wk = w_ref[...]
    bias = b_ref[...]
    h = _conv_in_relu(x, wk, bias, mask_l, mask_r, mask_t, mask_b, W, HW, Bt,
                      compute_dtype)                     # pass 1
    h = _conv_in_relu(h, wk, bias, mask_l, mask_r, mask_t, mask_b, W, HW, Bt,
                      compute_dtype)                     # pass 2 (same weights)
    for b in range(Bt):
        seg = h[:, b * HW:(b + 1) * HW] if Bt > 1 else h
        o_ref[0, b] = seg.astype(o_ref.dtype)


def _vmem_limit_bytes():
    # Raise the scoped-VMEM cap toward physical (128 MiB on v5e/v6e, 64 MiB on
    # v7x): ~3/4 of capacity, capped at 100 MiB. Falls back to a safe default.
    try:
        cap = int(pltpu.get_tpu_info().vmem_capacity_bytes)
        return int(min(100 * 2 ** 20, (cap * 3) // 4))
    except Exception:
        return 32 * 2 ** 20


def _pick_images_per_block(N, C, HW):
    # With small C the matmul M/K dims are tiny; widen the lane (N) dim of the
    # single MXU matmul by packing several images per grid step, as long as the
    # live f32 tap block (9*C*Bt*HW*4 B) stays a small slice of VMEM.
    best = 1
    for bt in range(1, N + 1):
        if N % bt != 0:
            continue
        if 9 * C * bt * HW * 4 <= 6 * 2 ** 20 and bt * HW <= 32768:
            best = bt
    return best


def convblock_forward(x_nchw, weight, bias, *, compute_dtype=jnp.bfloat16,
                      images_per_block=None):
    """ConvBlock forward.

    x_nchw : (N, C, H, W)
    weight : (C, C, 3, 3)  PyTorch OIHW conv weight (shared by both passes)
    bias   : (C,)
    returns: (N, C, H, W)
    """
    N, C, H, W = x_nchw.shape
    HW = H * W
    Bt = images_per_block or _pick_images_per_block(N, C, HW)
    assert N % Bt == 0
    G = N // Bt

    # Free metadata reshape only -- data stays in native NCHW order in HBM.
    x4 = x_nchw.reshape(G, Bt, C, HW)
    # One lane-dense weight block: (Cout, 9*Cin), column = (kh*3 + kw)*Cin + cin.
    w9 = jnp.transpose(weight, (0, 2, 3, 1)).reshape(C, 9 * C).astype(compute_dtype)
    b2 = bias.reshape(C, 1).astype(jnp.float32)

    kernel = functools.partial(_convblock_kernel, H=H, W=W, Bt=Bt,
                               compute_dtype=compute_dtype)
    out4 = pl.pallas_call(
        kernel,
        out_shape=jax.ShapeDtypeStruct((G, Bt, C, HW), x_nchw.dtype),
        grid=(G,),
        in_specs=[
            pl.BlockSpec((1, Bt, C, HW), lambda g: (g, 0, 0, 0)),  # image block
            pl.BlockSpec((C, 9 * C), lambda g: (0, 0)),            # resident weight
            pl.BlockSpec((C, 1), lambda g: (0, 0)),                # resident bias
        ],
        out_specs=pl.BlockSpec((1, Bt, C, HW), lambda g: (g, 0, 0, 0)),
        compiler_params=pltpu.CompilerParams(
            dimension_semantics=("parallel",),
            vmem_limit_bytes=_vmem_limit_bytes(),
        ),
    )(x4, w9, b2)
    return out4.reshape(N, C, H, W)


def _reference(x, weight, bias):
    """Pure-JAX reference matching PyTorch ConvBlock semantics (NCHW)."""
    def one(h):
        y = jax.lax.conv_general_dilated(
            h, weight, window_strides=(1, 1), padding=((1, 1), (1, 1)),
            dimension_numbers=("NCHW", "OIHW", "NCHW"),
            precision=jax.lax.Precision.HIGHEST)
        y = y + bias[None, :, None, None]
        mean = jnp.mean(y, axis=(2, 3), keepdims=True)
        var = jnp.var(y, axis=(2, 3), keepdims=True)     # biased, like InstanceNorm
        y = (y - mean) / jnp.sqrt(var + EPS)
        return jnp.maximum(y, 0.0)
    return one(one(x))


if __name__ == "__main__":
    key = jax.random.PRNGKey(0)
    kx, kw, kb = jax.random.split(key, 3)

    N, C, H, W = 2, 8, 16, 16

    x = jax.random.normal(kx, (N, C, H, W), dtype=jnp.float32)
    weight = jax.random.normal(kw, (C, C, 3, 3), dtype=jnp.float32) * 0.2
    bias = jax.random.normal(kb, (C,), dtype=jnp.float32) * 0.1

    ref = _reference(x, weight, bias)

    # f32 MXU operands: tight match against the reference.
    out_f32 = jax.block_until_ready(
        convblock_forward(x, weight, bias, compute_dtype=jnp.float32))
    assert out_f32.shape == (N, C, H, W)
    err32 = float(jnp.max(jnp.abs(out_f32 - ref)))
    assert jnp.allclose(out_f32, ref, atol=2e-3, rtol=2e-3), f"f32 max abs err {err32}"

    # bf16 MXU operands (default, per perf review): looser tolerance.
    out_bf16 = jax.block_until_ready(convblock_forward(x, weight, bias))
    assert out_bf16.shape == (N, C, H, W)
    errbf = float(jnp.max(jnp.abs(out_bf16 - ref)))
    assert jnp.allclose(out_bf16, ref, atol=4e-2, rtol=4e-2), f"bf16 max abs err {errbf}"

    print("KERNEL_OK")
</pallas_src>

<mosaic_0001>
module attributes {stable_mosaic.version = 11 : i64} {
  func.func @_convblock_kernel(%arg0: i32, %arg1: memref<1x2x8x256xf32, #tpu.memory_space<vmem>>, %arg2: memref<8x72xf32, #tpu.memory_space<vmem>>, %arg3: memref<8x1xf32, #tpu.memory_space<vmem>>, %arg4: memref<1x2x8x256xf32, #tpu.memory_space<vmem>>) attributes {dimension_semantics = [#tpu.dimension_semantics<parallel>], iteration_bounds = array<i64: 1>, scalar_prefetch = 0 : i64, scratch_operands = 0 : i64, tpu.core_type = #tpu.core_type<tc>, window_params = [{transform_indices = @transform_0, window_bounds = array<i64: 1, 2, 8, 256>}, {pipeline_mode = #tpu.pipeline_mode<synchronous>, transform_indices = @transform_1, window_bounds = array<i64: 8, 72>}, {pipeline_mode = #tpu.pipeline_mode<synchronous>, transform_indices = @transform_2, window_bounds = array<i64: 8, 1>}, {transform_indices = @transform_3, window_bounds = array<i64: 1, 2, 8, 256>}]} {
    %c0 = arith.constant 0 : index
    %c0_0 = arith.constant 0 : index
    %c0_1 = arith.constant 0 : index
    %c0_2 = arith.constant 0 : index
    %0 = vector.load %arg1[%c0, %c0_0, %c0_1, %c0_2] : memref<1x2x8x256xf32, #tpu.memory_space<vmem>>, vector<1x1x8x256xf32>
    %1 = vector.shape_cast %0 : vector<1x1x8x256xf32> to vector<8x256xf32>
    %c0_3 = arith.constant 0 : index
    %c1 = arith.constant 1 : index
    %c0_4 = arith.constant 0 : index
    %c0_5 = arith.constant 0 : index
    %2 = vector.load %arg1[%c0_3, %c1, %c0_4, %c0_5] : memref<1x2x8x256xf32, #tpu.memory_space<vmem>>, vector<1x1x8x256xf32>
    %3 = vector.shape_cast %2 : vector<1x1x8x256xf32> to vector<8x256xf32>
    %4 = tpu.concatenate %1, %3 in 1 : vector<8x256xf32>, vector<8x256xf32> -> vector<8x512xf32>
    %5 = tpu.iota {dimensions = array<i32: 1>} : vector<1x512xi32>
    %c16_i32 = arith.constant 16 : i32
    %c0_i32 = arith.constant 0 : i32
    %6 = arith.cmpi eq, %c16_i32, %c0_i32 : i32
    %c1_i32 = arith.constant 1 : i32
    %7 = arith.select %6, %c1_i32, %c16_i32 : i32
    %8 = vector.broadcast %7 : i32 to vector<1x512xi32>
    %9 = arith.remsi %5, %8 : vector<1x512xi32>
    %c0_i32_6 = arith.constant 0 : i32
    %10 = vector.broadcast %c0_i32_6 : i32 to vector<1x512xi32>
    %11 = arith.cmpi ne, %9, %10 : vector<1x512xi32>
    %c0_i32_7 = arith.constant 0 : i32
    %12 = vector.broadcast %c0_i32_7 : i32 to vector<1x512xi32>
    %13 = arith.cmpi slt, %9, %12 : vector<1x512xi32>
    %c0_i32_8 = arith.constant 0 : i32
    %14 = arith.cmpi slt, %7, %c0_i32_8 : i32
    %15 = vector.broadcast %14 : i1 to vector<1x512xi1>
    %16 = vector.broadcast %15 : vector<1x512xi1> to vector<1x512xi1>
    %17 = arith.xori %13, %16 : vector<1x512xi1>
    %18 = arith.andi %17, %11 : vector<1x512xi1>
    %19 = vector.broadcast %7 : i32 to vector<1x512xi32>
    %20 = arith.addi %9, %19 : vector<1x512xi32>
    %21 = arith.select %18, %20, %9 : vector<1x512xi1>, vector<1x512xi32>
    %c256_i32 = arith.constant 256 : i32
    %c0_i32_9 = arith.constant 0 : i32
    %22 = arith.cmpi eq, %c256_i32, %c0_i32_9 : i32
    %c1_i32_10 = arith.constant 1 : i32
    %23 = arith.select %22, %c1_i32_10, %c256_i32 : i32
    %24 = vector.broadcast %23 : i32 to vector<1x512xi32>
    %25 = arith.remsi %5, %24 : vector<1x512xi32>
    %c0_i32_11 = arith.constant 0 : i32
    %26 = vector.broadcast %c0_i32_11 : i32 to vector<1x512xi32>
    %27 = arith.cmpi ne, %25, %26 : vector<1x512xi32>
    %c0_i32_12 = arith.constant 0 : i32
    %28 = vector.broadcast %c0_i32_12 : i32 to vector<1x512xi32>
    %29 = arith.cmpi slt, %25, %28 : vector<1x512xi32>
    %c0_i32_13 = arith.constant 0 : i32
    %30 = arith.cmpi slt, %23, %c0_i32_13 : i32
    %31 = vector.broadcast %30 : i1 to vector<1x512xi1>
    %32 = vector.broadcast %31 : vector<1x512xi1> to vector<1x512xi1>
    %33 = arith.xori %29, %32 : vector<1x512xi1>
    %34 = arith.andi %33, %27 : vector<1x512xi1>
    %35 = vector.broadcast %23 : i32 to vector<1x512xi32>
    %36 = arith.addi %25, %35 : vector<1x512xi32>
    %37 = arith.select %34, %36, %25 : vector<1x512xi1>, vector<1x512xi32>
    %c1_i32_14 = arith.constant 1 : i32
    %38 = vector.broadcast %c1_i32_14 : i32 to vector<1x512xi32>
    %39 = arith.cmpi sge, %21, %38 : vector<1x512xi32>
    %c15_i32 = arith.constant 15 : i32
    %40 = vector.broadcast %c15_i32 : i32 to vector<1x512xi32>
    %41 = arith.cmpi slt, %21, %40 : vector<1x512xi32>
    %c16_i32_15 = arith.constant 16 : i32
    %42 = vector.broadcast %c16_i32_15 : i32 to vector<1x512xi32>
    %43 = arith.cmpi sge, %37, %42 : vector<1x512xi32>
    %c240_i32 = arith.constant 240 : i32
    %44 = vector.broadcast %c240_i32 : i32 to vector<1x512xi32>
    %45 = arith.cmpi slt, %37, %44 : vector<1x512xi32>
    %c0_16 = arith.constant 0 : index
    %c0_17 = arith.constant 0 : index
    %46 = vector.load %arg2[%c0_16, %c0_17] : memref<8x72xf32, #tpu.memory_space<vmem>>, vector<8x72xf32>
    %c0_18 = arith.constant 0 : index
    %c0_19 = arith.constant 0 : index
    %47 = vector.load %arg3[%c0_18, %c0_19] : memref<8x1xf32, #tpu.memory_space<vmem>>, vector<8x1xf32>
    %c1_i32_20 = arith.constant 1 : i32
    %48 = tpu.dynamic_rotate %4 by %c1_i32_20 dim 1 : vector<8x512xf32>, i32 -> vector<8x512xf32>
    %cst = arith.constant 0.000000e+00 : f32
    %49 = vector.shape_cast %39 : vector<1x512xi1> to vector<1x512xi1>
    %50 = vector.broadcast %49 : vector<1x512xi1> to vector<8x512xi1>
    %51 = vector.broadcast %cst : f32 to vector<8x512xf32>
    %52 = arith.select %50, %48, %51 : vector<8x512xi1>, vector<8x512xf32>
    %c511_i32 = arith.constant 511 : i32
    %53 = tpu.dynamic_rotate %4 by %c511_i32 dim 1 : vector<8x512xf32>, i32 -> vector<8x512xf32>
    %cst_21 = arith.constant 0.000000e+00 : f32
    %54 = vector.shape_cast %41 : vector<1x512xi1> to vector<1x512xi1>
    %55 = vector.broadcast %54 : vector<1x512xi1> to vector<8x512xi1>
    %56 = vector.broadcast %cst_21 : f32 to vector<8x512xf32>
    %57 = arith.select %55, %53, %56 : vector<8x512xi1>, vector<8x512xf32>
    %58 = tpu.concatenate %52, %4, %57 in 0 : vector<8x512xf32>, vector<8x512xf32>, vector<8x512xf32> -> vector<24x512xf32>
    %c16_i32_22 = arith.constant 16 : i32
    %59 = tpu.dynamic_rotate %58 by %c16_i32_22 dim 1 : vector<24x512xf32>, i32 -> vector<24x512xf32>
    %cst_23 = arith.constant 0.000000e+00 : f32
    %60 = vector.shape_cast %43 : vector<1x512xi1> to vector<1x512xi1>
    %61 = vector.broadcast %60 : vector<1x512xi1> to vector<24x512xi1>
    %62 = vector.broadcast %cst_23 : f32 to vector<24x512xf32>
    %63 = arith.select %61, %59, %62 : vector<24x512xi1>, vector<24x512xf32>
    %c496_i32 = arith.constant 496 : i32
    %64 = tpu.dynamic_rotate %58 by %c496_i32 dim 1 : vector<24x512xf32>, i32 -> vector<24x512xf32>
    %cst_24 = arith.constant 0.000000e+00 : f32
    %65 = vector.shape_cast %45 : vector<1x512xi1> to vector<1x512xi1>
    %66 = vector.broadcast %65 : vector<1x512xi1> to vector<24x512xi1>
    %67 = vector.broadcast %cst_24 : f32 to vector<24x512xf32>
    %68 = arith.select %66, %64, %67 : vector<24x512xi1>, vector<24x512xf32>
    %69 = tpu.concatenate %63, %58, %68 in 0 : vector<24x512xf32>, vector<24x512xf32>, vector<24x512xf32> -> vector<72x512xf32>
    %cst_25 = arith.constant dense<0.000000e+00> : vector<8x512xf32>
    %70 = tpu.matmul %46, %69, %cst_25 {dimension_numbers = #tpu.dot_dimension_numbers<[1], [0], [0], [1], [0, 0, 1, 1], [], []>} : vector<8x72xf32>, vector<72x512xf32>, vector<8x512xf32> -> vector<8x512xf32>
    %71 = vector.broadcast %47 : vector<8x1xf32> to vector<8x512xf32>
    %72 = arith.addf %70, %71 : vector<8x512xf32>
    %73 = vector.extract_strided_slice %72 {offsets = [0, 0], sizes = [8, 256], strides = [1, 1]} : vector<8x512xf32> to vector<8x256xf32>
    %cst_26 = arith.constant dense<0.000000e+00> : vector<8xf32>
    %74 = vector.multi_reduction <add>, %73, %cst_26 [1] : vector<8x256xf32> to vector<8xf32>
    %75 = vector.shape_cast %74 : vector<8xf32> to vector<8x1xf32>
    %76 = arith.mulf %73, %73 : vector<8x256xf32>
    %cst_27 = arith.constant dense<0.000000e+00> : vector<8xf32>
    %77 = vector.multi_reduction <add>, %76, %cst_27 [1] : vector<8x256xf32> to vector<8xf32>
    %78 = vector.shape_cast %77 : vector<8xf32> to vector<8x1xf32>
    %cst_28 = arith.constant 3.906250e-03 : f32
    %79 = vector.broadcast %cst_28 : f32 to vector<8x1xf32>
    %80 = arith.mulf %75, %79 : vector<8x1xf32>
    %cst_29 = arith.constant 3.906250e-03 : f32
    %81 = vector.broadcast %cst_29 : f32 to vector<8x1xf32>
    %82 = arith.mulf %78, %81 : vector<8x1xf32>
    %83 = arith.mulf %80, %80 : vector<8x1xf32>
    %84 = arith.subf %82, %83 : vector<8x1xf32>
    %cst_30 = arith.constant 0.000000e+00 : f32
    %85 = vector.broadcast %cst_30 : f32 to vector<8x1xf32>
    %86 = arith.maximumf %84, %85 : vector<8x1xf32>
    %87 = vector.broadcast %80 : vector<8x1xf32> to vector<8x256xf32>
    %88 = arith.subf %73, %87 : vector<8x256xf32>
    %cst_31 = arith.constant 9.99999974E-6 : f32
    %89 = vector.broadcast %cst_31 : f32 to vector<8x1xf32>
    %90 = arith.addf %86, %89 : vector<8x1xf32>
    %91 = math.rsqrt %90 : vector<8x1xf32>
    %92 = vector.broadcast %91 : vector<8x1xf32> to vector<8x256xf32>
    %93 = arith.mulf %88, %92 : vector<8x256xf32>
    %cst_32 = arith.constant 0.000000e+00 : f32
    %94 = vector.broadcast %cst_32 : f32 to vector<8x256xf32>
    %95 = arith.maximumf %93, %94 : vector<8x256xf32>
    %96 = vector.extract_strided_slice %72 {offsets = [0, 256], sizes = [8, 256], strides = [1, 1]} : vector<8x512xf32> to vector<8x256xf32>
    %cst_33 = arith.constant dense<0.000000e+00> : vector<8xf32>
    %97 = vector.multi_reduction <add>, %96, %cst_33 [1] : vector<8x256xf32> to vector<8xf32>
    %98 = vector.shape_cast %97 : vector<8xf32> to vector<8x1xf32>
    %99 = arith.mulf %96, %96 : vector<8x256xf32>
    %cst_34 = arith.constant dense<0.000000e+00> : vector<8xf32>
    %100 = vector.multi_reduction <add>, %99, %cst_34 [1] : vector<8x256xf32> to vector<8xf32>
    %101 = vector.shape_cast %100 : vector<8xf32> to vector<8x1xf32>
    %cst_35 = arith.constant 3.906250e-03 : f32
    %102 = vector.broadcast %cst_35 : f32 to vector<8x1xf32>
    %103 = arith.mulf %98, %102 : vector<8x1xf32>
    %cst_36 = arith.constant 3.906250e-03 : f32
    %104 = vector.broadcast %cst_36 : f32 to vector<8x1xf32>
    %105 = arith.mulf %101, %104 : vector<8x1xf32>
    %106 = arith.mulf %103, %103 : vector<8x1xf32>
    %107 = arith.subf %105, %106 : vector<8x1xf32>
    %cst_37 = arith.constant 0.000000e+00 : f32
    %108 = vector.broadcast %cst_37 : f32 to vector<8x1xf32>
    %109 = arith.maximumf %107, %108 : vector<8x1xf32>
    %110 = vector.broadcast %103 : vector<8x1xf32> to vector<8x256xf32>
    %111 = arith.subf %96, %110 : vector<8x256xf32>
    %cst_38 = arith.constant 9.99999974E-6 : f32
    %112 = vector.broadcast %cst_38 : f32 to vector<8x1xf32>
    %113 = arith.addf %109, %112 : vector<8x1xf32>
    %114 = math.rsqrt %113 : vector<8x1xf32>
    %115 = vector.broadcast %114 : vector<8x1xf32> to vector<8x256xf32>
    %116 = arith.mulf %111, %115 : vector<8x256xf32>
    %cst_39 = arith.constant 0.000000e+00 : f32
    %117 = vector.broadcast %cst_39 : f32 to vector<8x256xf32>
    %118 = arith.maximumf %116, %117 : vector<8x256xf32>
    %119 = tpu.concatenate %95, %118 in 1 : vector<8x256xf32>, vector<8x256xf32> -> vector<8x512xf32>
    %c1_i32_40 = arith.constant 1 : i32
    %120 = tpu.dynamic_rotate %119 by %c1_i32_40 dim 1 : vector<8x512xf32>, i32 -> vector<8x512xf32>
    %cst_41 = arith.constant 0.000000e+00 : f32
    %121 = vector.shape_cast %39 : vector<1x512xi1> to vector<1x512xi1>
    %122 = vector.broadcast %121 : vector<1x512xi1> to vector<8x512xi1>
    %123 = vector.broadcast %cst_41 : f32 to vector<8x512xf32>
    %124 = arith.select %122, %120, %123 : vector<8x512xi1>, vector<8x512xf32>
    %c511_i32_42 = arith.constant 511 : i32
    %125 = tpu.dynamic_rotate %119 by %c511_i32_42 dim 1 : vector<8x512xf32>, i32 -> vector<8x512xf32>
    %cst_43 = arith.constant 0.000000e+00 : f32
    %126 = vector.shape_cast %41 : vector<1x512xi1> to vector<1x512xi1>
    %127 = vector.broadcast %126 : vector<1x512xi1> to vector<8x512xi1>
    %128 = vector.broadcast %cst_43 : f32 to vector<8x512xf32>
    %129 = arith.select %127, %125, %128 : vector<8x512xi1>, vector<8x512xf32>
    %130 = tpu.concatenate %124, %119, %129 in 0 : vector<8x512xf32>, vector<8x512xf32>, vector<8x512xf32> -> vector<24x512xf32>
    %c16_i32_44 = arith.constant 16 : i32
    %131 = tpu.dynamic_rotate %130 by %c16_i32_44 dim 1 : vector<24x512xf32>, i32 -> vector<24x512xf32>
    %cst_45 = arith.constant 0.000000e+00 : f32
    %132 = vector.shape_cast %43 : vector<1x512xi1> to vector<1x512xi1>
    %133 = vector.broadcast %132 : vector<1x512xi1> to vector<24x512xi1>
    %134 = vector.broadcast %cst_45 : f32 to vector<24x512xf32>
    %135 = arith.select %133, %131, %134 : vector<24x512xi1>, vector<24x512xf32>
    %c496_i32_46 = arith.constant 496 : i32
    %136 = tpu.dynamic_rotate %130 by %c496_i32_46 dim 1 : vector<24x512xf32>, i32 -> vector<24x512xf32>
    %cst_47 = arith.constant 0.000000e+00 : f32
    %137 = vector.shape_cast %45 : vector<1x512xi1> to vector<1x512xi1>
    %138 = vector.broadcast %137 : vector<1x512xi1> to vector<24x512xi1>
    %139 = vector.broadcast %cst_47 : f32 to vector<24x512xf32>
    %140 = arith.select %138, %136, %139 : vector<24x512xi1>, vector<24x512xf32>
    %141 = tpu.concatenate %135, %130, %140 in 0 : vector<24x512xf32>, vector<24x512xf32>, vector<24x512xf32> -> vector<72x512xf32>
    %cst_48 = arith.constant dense<0.000000e+00> : vector<8x512xf32>
    %142 = tpu.matmul %46, %141, %cst_48 {dimension_numbers = #tpu.dot_dimension_numbers<[1], [0], [0], [1], [0, 0, 1, 1], [], []>} : vector<8x72xf32>, vector<72x512xf32>, vector<8x512xf32> -> vector<8x512xf32>
    %143 = vector.broadcast %47 : vector<8x1xf32> to vector<8x512xf32>
    %144 = arith.addf %142, %143 : vector<8x512xf32>
    %145 = vector.extract_strided_slice %144 {offsets = [0, 0], sizes = [8, 256], strides = [1, 1]} : vector<8x512xf32> to vector<8x256xf32>
    %cst_49 = arith.constant dense<0.000000e+00> : vector<8xf32>
    %146 = vector.multi_reduction <add>, %145, %cst_49 [1] : vector<8x256xf32> to vector<8xf32>
    %147 = vector.shape_cast %146 : vector<8xf32> to vector<8x1xf32>
    %148 = arith.mulf %145, %145 : vector<8x256xf32>
    %cst_50 = arith.constant dense<0.000000e+00> : vector<8xf32>
    %149 = vector.multi_reduction <add>, %148, %cst_50 [1] : vector<8x256xf32> to vector<8xf32>
    %150 = vector.shape_cast %149 : vector<8xf32> to vector<8x1xf32>
    %cst_51 = arith.constant 3.906250e-03 : f32
    %151 = vector.broadcast %cst_51 : f32 to vector<8x1xf32>
    %152 = arith.mulf %147, %151 : vector<8x1xf32>
    %cst_52 = arith.constant 3.906250e-03 : f32
    %153 = vector.broadcast %cst_52 : f32 to vector<8x1xf32>
    %154 = arith.mulf %150, %153 : vector<8x1xf32>
    %155 = arith.mulf %152, %152 : vector<8x1xf32>
    %156 = arith.subf %154, %155 : vector<8x1xf32>
    %cst_53 = arith.constant 0.000000e+00 : f32
    %157 = vector.broadcast %cst_53 : f32 to vector<8x1xf32>
    %158 = arith.maximumf %156, %157 : vector<8x1xf32>
    %159 = vector.broadcast %152 : vector<8x1xf32> to vector<8x256xf32>
    %160 = arith.subf %145, %159 : vector<8x256xf32>
    %cst_54 = arith.constant 9.99999974E-6 : f32
    %161 = vector.broadcast %cst_54 : f32 to vector<8x1xf32>
    %162 = arith.addf %158, %161 : vector<8x1xf32>
    %163 = math.rsqrt %162 : vector<8x1xf32>
    %164 = vector.broadcast %163 : vector<8x1xf32> to vector<8x256xf32>
    %165 = arith.mulf %160, %164 : vector<8x256xf32>
    %cst_55 = arith.constant 0.000000e+00 : f32
    %166 = vector.broadcast %cst_55 : f32 to vector<8x256xf32>
    %167 = arith.maximumf %165, %166 : vector<8x256xf32>
    %168 = vector.extract_strided_slice %144 {offsets = [0, 256], sizes = [8, 256], strides = [1, 1]} : vector<8x512xf32> to vector<8x256xf32>
    %cst_56 = arith.constant dense<0.000000e+00> : vector<8xf32>
    %169 = vector.multi_reduction <add>, %168, %cst_56 [1] : vector<8x256xf32> to vector<8xf32>
    %170 = vector.shape_cast %169 : vector<8xf32> to vector<8x1xf32>
    %171 = arith.mulf %168, %168 : vector<8x256xf32>
    %cst_57 = arith.constant dense<0.000000e+00> : vector<8xf32>
    %172 = vector.multi_reduction <add>, %171, %cst_57 [1] : vector<8x256xf32> to vector<8xf32>
    %173 = vector.shape_cast %172 : vector<8xf32> to vector<8x1xf32>
    %cst_58 = arith.constant 3.906250e-03 : f32
    %174 = vector.broadcast %cst_58 : f32 to vector<8x1xf32>
    %175 = arith.mulf %170, %174 : vector<8x1xf32>
    %cst_59 = arith.constant 3.906250e-03 : f32
    %176 = vector.broadcast %cst_59 : f32 to vector<8x1xf32>
    %177 = arith.mulf %173, %176 : vector<8x1xf32>
    %178 = arith.mulf %175, %175 : vector<8x1xf32>
    %179 = arith.subf %177, %178 : vector<8x1xf32>
    %cst_60 = arith.constant 0.000000e+00 : f32
    %180 = vector.broadcast %cst_60 : f32 to vector<8x1xf32>
    %181 = arith.maximumf %179, %180 : vector<8x1xf32>
    %182 = vector.broadcast %175 : vector<8x1xf32> to vector<8x256xf32>
    %183 = arith.subf %168, %182 : vector<8x256xf32>
    %cst_61 = arith.constant 9.99999974E-6 : f32
    %184 = vector.broadcast %cst_61 : f32 to vector<8x1xf32>
    %185 = arith.addf %181, %184 : vector<8x1xf32>
    %186 = math.rsqrt %185 : vector<8x1xf32>
    %187 = vector.broadcast %186 : vector<8x1xf32> to vector<8x256xf32>
    %188 = arith.mulf %183, %187 : vector<8x256xf32>
    %cst_62 = arith.constant 0.000000e+00 : f32
    %189 = vector.broadcast %cst_62 : f32 to vector<8x256xf32>
    %190 = arith.maximumf %188, %189 : vector<8x256xf32>
    %191 = tpu.concatenate %167, %190 in 1 : vector<8x256xf32>, vector<8x256xf32> -> vector<8x512xf32>
    %192 = vector.extract_strided_slice %191 {offsets = [0, 0], sizes = [8, 256], strides = [1, 1]} : vector<8x512xf32> to vector<8x256xf32>
    %c0_63 = arith.constant 0 : index
    %c0_64 = arith.constant 0 : index
    %c0_65 = arith.constant 0 : index
    %c0_66 = arith.constant 0 : index
    %193 = vector.load %arg4[%c0_63, %c0_64, %c0_65, %c0_66] : memref<1x2x8x256xf32, #tpu.memory_space<vmem>>, vector<1x1x8x256xf32>
    %194 = vector.shape_cast %193 : vector<1x1x8x256xf32> to vector<8x256xf32>
    %195 = vector.shape_cast %192 : vector<8x256xf32> to vector<1x1x8x256xf32>
    tpu.vector_store %arg4[%c0_63, %c0_64, %c0_65, %c0_66], %195 {strides = array<i32>} : memref<1x2x8x256xf32, #tpu.memory_space<vmem>>, vector<1x1x8x256xf32>,
    %196 = vector.extract_strided_slice %191 {offsets = [0, 256], sizes = [8, 256], strides = [1, 1]} : vector<8x512xf32> to vector<8x256xf32>
    %c0_67 = arith.constant 0 : index
    %c1_68 = arith.constant 1 : index
    %c0_69 = arith.constant 0 : index
    %c0_70 = arith.constant 0 : index
    %197 = vector.load %arg4[%c0_67, %c1_68, %c0_69, %c0_70] : memref<1x2x8x256xf32, #tpu.memory_space<vmem>>, vector<1x1x8x256xf32>
    %198 = vector.shape_cast %197 : vector<1x1x8x256xf32> to vector<8x256xf32>
    %199 = vector.shape_cast %196 : vector<8x256xf32> to vector<1x1x8x256xf32>
    tpu.vector_store %arg4[%c0_67, %c1_68, %c0_69, %c0_70], %199 {strides = array<i32>} : memref<1x2x8x256xf32, #tpu.memory_space<vmem>>, vector<1x1x8x256xf32>,
    return
  }
  func.func @transform_0(%arg0: i32) -> (i32, i32, i32, i32) {
    %c0_i32 = arith.constant 0 : i32
    %c0_i32_0 = arith.constant 0 : i32
    %c0_i32_1 = arith.constant 0 : i32
    %c0_i32_2 = arith.constant 0 : i32
    return %arg0, %c0_i32, %c0_i32_0, %c0_i32_1 : i32, i32, i32, i32
  }
  func.func @transform_1(%arg0: i32) -> (i32, i32) {
    %c0_i32 = arith.constant 0 : i32
    %c0_i32_0 = arith.constant 0 : i32
    %c0_i32_1 = arith.constant 0 : i32
    return %c0_i32, %c0_i32_0 : i32, i32
  }
  func.func @transform_2(%arg0: i32) -> (i32, i32) {
    %c0_i32 = arith.constant 0 : i32
    %c0_i32_0 = arith.constant 0 : i32
    %c0_i32_1 = arith.constant 0 : i32
    return %c0_i32, %c0_i32_0 : i32, i32
  }
  func.func @transform_3(%arg0: i32) -> (i32, i32, i32, i32) {
    %c0_i32 = arith.constant 0 : i32
    %c0_i32_0 = arith.constant 0 : i32
    %c0_i32_1 = arith.constant 0 : i32
    %c0_i32_2 = arith.constant 0 : i32
    return %arg0, %c0_i32, %c0_i32_0, %c0_i32_1 : i32, i32, i32, i32
  }
}

</mosaic_0001>

<bundles_post_ra>
// kernel: tpu_custom_call.1
= control target key start
LH: loop header
LB: loop body
LE: loop exit
PB: predicated region body
PF: predicated region fallthrough
CT: control target
= control target key end

     0   :  { %8 = vsyncpa [#allocation3], 0  ;;  %s1540_s0 = inlined_call_operand.hbm [shape: f32[1,2,8,256], index: 0, kind: input, shape index: {}]   ;;  %s1541_s1 = inlined_call_operand.vmem [shape: f32[8,72], index: 1, kind: input, shape index: {}]   ;;  %s1542_s2 = inlined_call_operand.vmem [shape: f32[8,1], index: 2, kind: input, shape index: {}]   ;;  %s1543_s3 = inlined_call_operand.hbm [shape: f32[1,2,8,256], index: 3, kind: output, shape index: {}]  }
   0x1   :  { %9 = vsyncpa [#allocation4], 0  ;;  %s950_s12 = smov [#allocation2]  }
   0x2   :  { %s15_s13 = sshll.u32 %s950_s12, 4  ;;  %s16_s13 = int_to_ptr.vmem [resolvable:$true] %s15_s13 }
   0x3   :  { %s914_s14 = scalar_lea.vmem %s16_s13, 512  ;;  %p919_p1 = scmp.lt.s32.totalorder %s16_s13, %s16_s13 }
   0x4   :  { %p915_p0 = scmp.ne.s32.totalorder %s16_s13, %s914_s14  ;;  %p920_p2 = scmp.lt.s32.totalorder %s914_s14, %s914_s14 }
   0x6   :  { %p921_p3 = por %p920_p2, %p919_p1 }
   0x8   :  { %p922_p4 = pnand %p921_p3, %p915_p0 }
   0xa   :  { %925 = shalt.err (!%p922_p4)
}
   0xb   :  { %s951_s15 = smov 256   ;;  %s952_s16 = smov 16  }
   0xc   :  { %21 = dma.hbm_to_vmem [thread:$0]  %s1540_s0, 512, %s16_s13, [#allocation3], %s951_s15, %s951_s15, %s952_s16  }
   0xd   :  { %946 = dma.done.wait [#allocation3], 512  }
   0xe   :  { %947 = vsyncadd [#allocation3], 4294966784  ;;  %v985_v0 = vld [vmem:[#allocation2 + $0x10] sm:$0xff]  ;;  %v987_v1 = vld [vmem:[#allocation2] sm:$0xff]  ;;  %s953_s19 = smov 127   ;;  %s954_s0 = smov 1   ;;  %v34_v4 = vlaneseq }
   0xf   :  { %182 = vrot.lane.b32.xlu1 %v985_v0, %s953_s19  ;;  %178 = vrot.lane.b32.xlu0 %v987_v1, %s953_s19  ;;  %v993_v2 = vld [vmem:[#allocation2 + $0x18] sm:$0xff]  ;;  %v995_v3 = vld [vmem:[#allocation2 + $0x8] sm:$0xff]  ;;  %s955_s20 = smov 112   ;;  %v956_v45 = vmov 0.0   ;;  %v957_v46 = vmov 0   ;;  %v152_v47 = vld [vmem:[%s1542_s2] sm:$0xff] }
  0x10   :  { %v1025_v5 = vand.u32 127, %v34_v4  ;;  %390 = vmatprep.mubr.f32.mxu0 %v956_v45  ;;  %461 = vmatprep.mubr.f32.mxu1 %v956_v45 }
  0x11   :  { %897 = vset.pattern.permute.xlu0 %v957_v46 }
  0x12   :  { %v1028_v6 = vadd.s32 128, %v1025_v5  ;;  %v43_v7 = vand.u32 15, %v1025_v5  ;;  %v1033_v9 = vadd.s32 256, %v1025_v5  ;;  %v1036_v10 = vadd.s32 384, %v1025_v5 }
  0x13   :  { %184 = vrot.lane.b32.xlu1 %v993_v2, %s953_s19  ;;  %180 = vrot.lane.b32.xlu0 %v995_v3, %s953_s19  ;;  %vm186_vm0 = vcmp.lt.s32.totalorder %v1025_v5, 127  ;;  %vm161_vm3 = vcmp.lt.s32.totalorder %v1025_v5, 1  ;;  %vm1544_vm12 = vcmp.lt.s32.totalorder %v1025_v5, 112  ;;  %vm1546_vm13 = vcmp.lt.s32.totalorder %v1025_v5, 16 }
  0x14   :  { %v50_v8 = vand.u32 15, %v1028_v6  ;;  %vm1039_vm1 = vcmp.lt.s32.totalorder %v43_v7, 15  ;;  %v57_v15 = vand.u32 15, %v1033_v9  ;;  %v64_v16 = vand.u32 15, %v1036_v10 }
  0x15   :  { %vm1098_vm7 = vcmp.ge.s32.totalorder %v43_v7, 1  ;;  %v98_v56 = vand.u32 255, %v1028_v6  ;;  %v112_v57 = vand.u32 255, %v1036_v10 }
  0x16   :  { %vm1043_vm2 = vcmp.lt.s32.totalorder %v50_v8, 15  ;;  %vm1074_vm4 = vcmp.lt.s32.totalorder %v57_v15, 15  ;;  %vm1078_vm5 = vcmp.lt.s32.totalorder %v64_v16, 15  ;;  %vm1086_vm6 = vcmp.ge.s32.totalorder %v50_v8, 1 }
  0x17   :  { %155 = vrot.lane.b32.xlu1 %v995_v3, %s954_s0  ;;  %153 = vrot.lane.b32.xlu0 %v987_v1, %s954_s0  ;;  %vm1113_vm8 = vcmp.ge.s32.totalorder %v64_v16, 1  ;;  %vm1126_vm9 = vcmp.ge.s32.totalorder %v57_v15, 1  ;;  %vm1161_vm10 = vcmp.lt.s32.totalorder %v98_v56, 240  ;;  %vm1165_vm11 = vcmp.lt.s32.totalorder %v112_v57, 240 }
  0x1b   :  { %159 = vrot.lane.b32.xlu1 %v993_v2, %s954_s0  ;;  %157 = vrot.lane.b32.xlu0 %v985_v0, %s954_s0 }
  0x1f   :  { %262 = vrot.lane.b32.xlu0 %v987_v1, %s955_s20  ;;  %268 = vrot.lane.b32.xlu1 %v995_v3, %s955_s20 }
  0x23   :  { %274 = vrot.lane.b32.xlu0 %v985_v0, %s955_s20  ;;  %280 = vrot.lane.b32.xlu1 %v993_v2, %s955_s20 }
  0x27   :  { %205 = vrot.lane.b32.xlu0 %v987_v1, %s952_s16  ;;  %211 = vrot.lane.b32.xlu1 %v995_v3, %s952_s16 }
  0x2b   :  { %217 = vrot.lane.b32.xlu0 %v985_v0, %s952_s16  ;;  %223 = vrot.lane.b32.xlu1 %v993_v2, %s952_s16 }
  0x81   :  { %v183_v11 = vpop.permute.xlu1 %182  ;;  %v179_v12 = vpop.permute.xlu0 %178 }
  0x85   :  { %v185_v17 = vpop.permute.xlu1 %184  ;;  %v181_v18 = vpop.permute.xlu0 %180 }
  0x86   :  { %v1051_v19 = vsel %vm186_vm0, %v181_v18, %v183_v11  ;;  %v1055_v20 = vsel %vm186_vm0, %v179_v12, %v181_v18  ;;  %v1066_v23 = vsel %vm186_vm0, %v183_v11, %v185_v17  ;;  %v1070_v24 = vsel %vm186_vm0, %v185_v17, %v179_v12 }
  0x87   :  { %v199_v21 = vsel %vm1039_vm1, %v1055_v20, 0.0  ;;  %v200_v22 = vsel %vm1043_vm2, %v1051_v19, 0.0  ;;  %v201_v31 = vsel %vm1074_vm4, %v1066_v23, 0.0  ;;  %v202_v32 = vsel %vm1078_vm5, %v1070_v24, 0.0 }
  0x88   :  { %264 = vrot.lane.b32.xlu0 %v199_v21, %s955_s20  ;;  %270 = vrot.lane.b32.xlu1 %v200_v22, %s955_s20 }
  0x89   :  { %v156_v27 = vpop.permute.xlu1 %155  ;;  %v154_v28 = vpop.permute.xlu0 %153 }
  0x8a   :  { %v1084_v29 = vsel %vm161_vm3, %v154_v28, %v156_v27 }
  0x8b   :  { %v175_v36 = vsel %vm1086_vm6, %v1084_v29, 0.0 }
  0x8c   :  { %276 = vrot.lane.b32.xlu0 %v201_v31, %s955_s20  ;;  %282 = vrot.lane.b32.xlu1 %v202_v32, %s955_s20 }
  0x8d   :  { %v160_v34 = vpop.permute.xlu1 %159  ;;  %v158_v35 = vpop.permute.xlu0 %157 }
  0x8e   :  { %v1107_v37 = vsel %vm161_vm3, %v160_v34, %v154_v28  ;;  %v1111_v38 = vsel %vm161_vm3, %v158_v35, %v160_v34  ;;  %v1122_v41 = vsel %vm161_vm3, %v156_v27, %v158_v35  ;;  %v91_v35 = vand.u32 255, %v1025_v5 }
  0x8f   :  { %v174_v40 = vsel %vm1098_vm7, %v1107_v37, 0.0  ;;  %v177_v43 = vsel %vm1113_vm8, %v1111_v38, 0.0  ;;  %v176_v44 = vsel %vm1126_vm9, %v1122_v41, 0.0 }
  0x90   :  { %260 = vrot.lane.b32.xlu0 %v174_v40, %s955_s20  ;;  %266 = vrot.lane.b32.xlu1 %v175_v36, %s955_s20  ;;  %vm1233_vm14 = vcmp.ge.s32.totalorder %v91_v35, 16 }
  0x91   :  { %v269_v48 = vpop.permute.xlu1 %268  ;;  %v263_v49 = vpop.permute.xlu0 %262 }
  0x92   :  { %v292_v16 = vsel %vm1544_vm12, %v263_v49, %v269_v48 }
  0x94   :  { %272 = vrot.lane.b32.xlu0 %v176_v44, %s955_s20  ;;  %278 = vrot.lane.b32.xlu1 %v177_v43, %s955_s20 }
  0x95   :  { %v281_v50 = vpop.permute.xlu1 %280  ;;  %v275_v51 = vpop.permute.xlu0 %274 }
  0x96   :  { %v289_v10 = vsel %vm1544_vm12, %v269_v48, %v275_v51  ;;  %v295_v11 = vsel %vm1544_vm12, %v281_v50, %v263_v49  ;;  %v286_v17 = vsel %vm1544_vm12, %v275_v51, %v281_v50 }
  0x98   :  { %207 = vrot.lane.b32.xlu0 %v199_v21, %s952_s16  ;;  %213 = vrot.lane.b32.xlu1 %v200_v22, %s952_s16 }
  0x99   :  { %v1151_v52 = vpop.permute.xlu1 %211  ;;  %v1153_v53 = vpop.permute.xlu0 %205 }
  0x9c   :  { %219 = vrot.lane.b32.xlu0 %v201_v31, %s952_s16  ;;  %225 = vrot.lane.b32.xlu1 %v202_v32, %s952_s16 }
  0x9d   :  { %v1155_v54 = vpop.permute.xlu1 %223  ;;  %v1157_v55 = vpop.permute.xlu0 %217 }
  0xa0   :  { %203 = vrot.lane.b32.xlu0 %v174_v40, %s952_s16  ;;  %209 = vrot.lane.b32.xlu1 %v175_v36, %s952_s16  ;;  %v105_v36 = vand.u32 255, %v1033_v9 }
  0xa2   :  { %vm1237_vm15 = vcmp.ge.s32.totalorder %v105_v36, 16 }
  0xa4   :  { %215 = vrot.lane.b32.xlu0 %v176_v44, %s952_s16  ;;  %221 = vrot.lane.b32.xlu1 %v177_v43, %s952_s16 }
  0xa8   :  { %319 = vperm.xlu0 %897, %v152_v47   ;;  %v1282_v47 = vld [vmem:[%s1541_s1] sm:$0xff]  ;;  %s958_s1 = smov [#allocation5]  }
  0xa9   :  { %s832_s24 = sshll.u32 %s958_s1, 4  ;;  %s833_s24 = int_to_ptr.vmem [resolvable:$true] %s832_s24 }
  0xaa   :  { %s926_s25 = scalar_lea.vmem %s833_s24, 512  ;;  %p931_p6 = scmp.lt.s32.totalorder %s833_s24, %s833_s24 }
  0xab   :  { %p927_p5 = scmp.ne.s32.totalorder %s833_s24, %s926_s25  ;;  %p932_p7 = scmp.lt.s32.totalorder %s926_s25, %s926_s25 }
  0xad   :  { %p933_p8 = por %p932_p7, %p931_p6 }
  0xaf   :  { %p934_p9 = pnand %p933_p8, %p927_p5 }
  0xfa   :  { %v271_v58 = vpop.permute.xlu1 %270  ;;  %v265_v59 = vpop.permute.xlu0 %264 }
  0xfb   :  { %v293_v8 = vsel %vm1544_vm12, %v265_v59, %v271_v58 }
  0xfe   :  { %v283_v62 = vpop.permute.xlu1 %282  ;;  %v277_v63 = vpop.permute.xlu0 %276 }
  0xff   :  { %v290_v4 = vsel %vm1544_vm12, %v271_v58, %v277_v63  ;;  %v296_v6 = vsel %vm1544_vm12, %v283_v62, %v265_v59  ;;  %v287_v7 = vsel %vm1544_vm12, %v277_v63, %v283_v62 }
 0x100   :  { %844 = vmatprep.subr.msk.mxu0 %vm1161_vm10, %v290_v4  ;;  %855 = vmatprep.subr.msk.mxu1 %vm1165_vm11, %v296_v6 }
 0x101   :  { %341 = vmatpush1.msra.mxu0 %v293_v8  ;;  %412 = vmatpush1.msra.mxu1 %v287_v7 }
 0x102   :  { %v267_v12 = vpop.permute.xlu1 %266  ;;  %845 = vmatprep.subr.msk.mxu0 %vm1161_vm10, %v289_v10  ;;  %856 = vmatprep.subr.msk.mxu1 %vm1165_vm11, %v295_v11  ;;  %v261_v15 = vpop.permute.xlu0 %260 }
 0x103   :  { %343 = vmatpush1.msra.mxu0 %v292_v16  ;;  %414 = vmatpush1.msra.mxu1 %v286_v17  ;;  %v291_v31 = vsel %vm1544_vm12, %v261_v15, %v267_v12 }
 0x106   :  { %v279_v18 = vpop.permute.xlu1 %278  ;;  %v273_v21 = vpop.permute.xlu0 %272 }
 0x107   :  { %v294_v22 = vsel %vm1544_vm12, %v279_v18, %v261_v15  ;;  %v288_v27 = vsel %vm1544_vm12, %v267_v12, %v273_v21  ;;  %v285_v28 = vsel %vm1544_vm12, %v273_v21, %v279_v18  ;;  %vm1545_vm12 = vcmask 588800  }
 0x108   :  { %846 = vmatprep.subr.msk.mxu0 %vm1161_vm10, %v288_v27  ;;  %857 = vmatprep.subr.msk.mxu1 %vm1165_vm11, %v294_v22 }
 0x109   :  { %345 = vmatpush1.msra.mxu0 %v291_v31  ;;  %416 = vmatpush1.msra.mxu1 %v285_v28 }
 0x10a   :  { %v214_v32 = vpop.permute.xlu1 %213  ;;  %847 = vmatprep.subr.msk.mxu0 %vm1043_vm2, %v1051_v19  ;;  %858 = vmatprep.subr.msk.mxu1 %vm1078_vm5, %v1070_v24  ;;  %v208_v34 = vpop.permute.xlu0 %207  ;;  %v235_v24 = vsel %vm1546_vm13, %v1153_v53, %v1151_v52 }
 0x10b   :  { %848 = vmatpush1.msk.msra.mxu0 %vm1039_vm1, %v1055_v20  ;;  %859 = vmatpush1.msk.msra.mxu1 %vm1074_vm4, %v1066_v23 }
 0x10c   :  { %348 = vmatprep.subr.mxu0 %v995_v3  ;;  %419 = vmatprep.subr.mxu1 %v993_v2  ;;  %v236_v3 = vsel %vm1546_vm13, %v208_v34, %v214_v32 }
 0x10d   :  { %349 = vmatpush1.msra.mxu0 %v987_v1  ;;  %420 = vmatpush1.msra.mxu1 %v985_v0  ;;  %v1571_v1 = vmov 0 }
 0x10e   :  { %v226_v19 = vpop.permute.xlu1 %225  ;;  %849 = vmatprep.subr.msk.mxu0 %vm1086_vm6, %v1084_v29  ;;  %860 = vmatprep.subr.msk.mxu1 %vm1113_vm8, %v1111_v38  ;;  %v220_v9 = vpop.permute.xlu0 %219  ;;  %v1572_v1 = vsel %vm1237_vm15, 4294967295, %v1571_v1  ;;  %v229_v29 = vsel %vm1546_vm13, %v1157_v55, %v1155_v54  ;;  %v238_v38 = vsel %vm1546_vm13, %v1155_v54, %v1153_v53 }
 0x10f   :  { %v239_v0 = vsel %vm1546_vm13, %v226_v19, %v208_v34  ;;  %v233_v20 = vsel %vm1546_vm13, %v214_v32, %v220_v9  ;;  %850 = vmatpush1.msk.msra.mxu0 %vm1098_vm7, %v1107_v37  ;;  %861 = vmatpush1.msk.msra.mxu1 %vm1126_vm9, %v1122_v41  ;;  %v230_v23 = vsel %vm1546_vm13, %v220_v9, %v226_v19 }
 0x110   :  { %352 = vmatprep.subr.mxu0 %v236_v3  ;;  %423 = vmatprep.subr.mxu1 %v230_v23  ;;  %v232_v37 = vsel %vm1546_vm13, %v1151_v52, %v1157_v55 }
 0x111   :  { %851 = vmatpush1.msk.msra.mxu0 %vm1233_vm14, %v239_v0  ;;  %862 = vmatpush1.msk.msra.mxu1 %vm1237_vm15, %v233_v20 }
 0x112   :  { %v210_v40 = vpop.permute.xlu1 %209  ;;  %354 = vmatprep.subr.mxu0 %v235_v24  ;;  %425 = vmatprep.subr.mxu1 %v229_v29  ;;  %v204_v41 = vpop.permute.xlu0 %203 }
 0x113   :  { %852 = vmatpush1.msk.msra.mxu0 %vm1233_vm14, %v238_v38  ;;  %863 = vmatpush1.msk.msra.mxu1 %vm1237_vm15, %v232_v37  ;;  %v234_v43 = vsel %vm1546_vm13, %v204_v41, %v210_v40 }
 0x114   :  { %356 = vmatprep.subr.mxu0 %v234_v43 }
 0x116   :  { %v222_v44 = vpop.permute.xlu1 %221  ;;  %v216_v46 = vpop.permute.xlu0 %215 }
 0x117   :  { %v237_v48 = vsel %vm1546_vm13, %v222_v44, %v204_v41  ;;  %v231_v49 = vsel %vm1546_vm13, %v210_v40, %v216_v46  ;;  %v228_v50 = vsel %vm1546_vm13, %v216_v46, %v222_v44 }
 0x118   :  { %853 = vmatpush1.msk.msra.mxu0 %vm1233_vm14, %v237_v48  ;;  %427 = vmatprep.subr.mxu1 %v228_v50 }
 0x119   :  { %854 = vmatmul.mubr.msk.f32.vlgmr.msra.gmra.mxu0 %vm1545_vm12, %v1282_v47  ;;  %864 = vmatpush1.msk.msra.mxu1 %vm1237_vm15, %v231_v49 }
 0x11a   :  { %865 = vmatmul.mubr.msk.f32.vlgmr.msra.gmra.mxu1 %vm1545_vm12, %v1282_v47  ;;  %702 = vmatprep.mubr.f32.mxu0 %v956_v45 }
 0x11b   :  { %773 = vmatprep.mubr.f32.mxu1 %v956_v45 }
 0x123   :  { %v1300_v52 = vpop.permute.xlu0 %319 }
 0x1d9   :  { %v392_v51 = vpop.f32.mrf.mxu0 }
 0x1da   :  { %v463_v53 = vpop.f32.mrf.mxu1  ;;  %v393_v58 = vadd.f32 %v392_v51, %v1300_v52 }
 0x1db   :  { %v464_v54 = vadd.f32 %v463_v53, %v1300_v52  ;;  %v394_v55 = vpop.f32.mrf.mxu0 }
 0x1dc   :  { %v395_v56 = vadd.f32 %v394_v55, %v1300_v52  ;;  %v465_v57 = vpop.f32.mrf.mxu1  ;;  %v471_v45 = vmul.f32 %v393_v58, %v393_v58 }
 0x1dd   :  { %v466_v59 = vadd.f32 %v465_v57, %v1300_v52  ;;  %v492_v6 = vmul.f32 %v464_v54, %v464_v54 }
 0x1de   :  { %v468_v62 = vadd.f32 %v395_v56, %v393_v58  ;;  %v472_v63 = vmul.f32 %v395_v56, %v395_v56 }
 0x1df   :  { %v489_v4 = vadd.f32 %v466_v59, %v464_v54  ;;  %v493_v7 = vmul.f32 %v466_v59, %v466_v59 }
 0x1e0   :  { %469 = vadd.xlane.f32.xlu1 %v468_v62  ;;  %v473_v8 = vadd.f32 %v472_v63, %v471_v45 }
 0x1e1   :  { %490 = vadd.xlane.f32.xlu0 %v489_v4  ;;  %v494_v10 = vadd.f32 %v493_v7, %v492_v6 }
 0x1e4   :  { %474 = vadd.xlane.f32.xlu1 %v473_v8 }
 0x1e5   :  { %495 = vadd.xlane.f32.xlu0 %v494_v10 }
 0x269   :  { %v470_v11 = vpop.xlane.xlu1 %469 }
 0x26a   :  { %v476_v12 = vmul.f32 0.00390625, %v470_v11  ;;  %v491_v15 = vpop.xlane.xlu0 %490 }
 0x26b   :  { %v497_v16 = vmul.f32 0.00390625, %v491_v15 }
 0x26c   :  { %v478_v18 = vmul.f32 %v476_v12, %v476_v12  ;;  %v481_v9 = vsub.f32 %v393_v58, %v476_v12  ;;  %v482_v3 = vsub.f32 %v395_v56, %v476_v12 }
 0x26d   :  { %v475_v17 = vpop.xlane.xlu1 %474  ;;  %v499_v27 = vmul.f32 %v497_v16, %v497_v16  ;;  %v502_v23 = vsub.f32 %v464_v54, %v497_v16  ;;  %v503_v41 = vsub.f32 %v466_v59, %v497_v16 }
 0x26e   :  { %v477_v21 = vmul.f32 0.00390625, %v475_v17  ;;  %v496_v22 = vpop.xlane.xlu0 %495 }
 0x26f   :  { %v498_v28 = vmul.f32 0.00390625, %v496_v22 }
 0x270   :  { %v479_v31 = vsub.f32 %v477_v21, %v478_v18 }
 0x271   :  { %v500_v32 = vsub.f32 %v498_v28, %v499_v27 }
 0x272   :  { %v480_v34 = vmax.f32 %v479_v31, 0.0 }
 0x273   :  { %v501_v35 = vmax.f32 %v500_v32, 0.0 }
 0x274   :  { %v483_v36 = vadd.f32 1e-05, %v480_v34 }
 0x275   :  { %v504_v19 = vadd.f32 1e-05, %v501_v35 }
 0x276   :  { %898 = vrsqrt.f32 %v483_v36 }
 0x277   :  { %900 = vrsqrt.f32 %v504_v19 }
 0x283   :  { %v899_v0 = vpop.eup %898 }
 0x284   :  { %v901_v20 = vpop.eup %900  ;;  %v486_v24 = vmul.f32 %v899_v0, %v482_v3  ;;  %v485_v29 = vmul.f32 %v899_v0, %v481_v9 }
 0x285   :  { %v506_v40 = vmul.f32 %v901_v20, %v502_v23  ;;  %v507_v44 = vmul.f32 %v901_v20, %v503_v41 }
 0x286   :  { %v1306_v37 = vmax.f32 %v486_v24, 0.0  ;;  %v1308_v38 = vmax.f32 %v485_v29, 0.0 }
 0x287   :  { %v1314_v43 = vmax.f32 %v506_v40, 0.0  ;;  %v1320_v46 = vmax.f32 %v507_v44, 0.0 }
 0x288   :  { %528 = vrot.lane.b32.xlu0 %v1306_v37, %s953_s19  ;;  %526 = vrot.lane.b32.xlu1 %v1308_v38, %s953_s19 }
 0x28c   :  { %510 = vrot.lane.b32.xlu0 %v1308_v38, %s954_s0  ;;  %530 = vrot.lane.b32.xlu1 %v1314_v43, %s953_s19 }
 0x290   :  { %514 = vrot.lane.b32.xlu0 %v1314_v43, %s954_s0  ;;  %532 = vrot.lane.b32.xlu1 %v1320_v46, %s953_s19 }
 0x294   :  { %592 = vrot.lane.b32.xlu0 %v1308_v38, %s955_s20  ;;  %512 = vrot.lane.b32.xlu1 %v1306_v37, %s954_s0 }
 0x298   :  { %604 = vrot.lane.b32.xlu0 %v1314_v43, %s955_s20  ;;  %516 = vrot.lane.b32.xlu1 %v1320_v46, %s954_s0 }
 0x29c   :  { %544 = vrot.lane.b32.xlu0 %v1308_v38, %s952_s16  ;;  %598 = vrot.lane.b32.xlu1 %v1306_v37, %s955_s20 }
 0x2a0   :  { %556 = vrot.lane.b32.xlu0 %v1314_v43, %s952_s16  ;;  %610 = vrot.lane.b32.xlu1 %v1320_v46, %s955_s20 }
 0x2a4   :  { %550 = vrot.lane.b32.xlu1 %v1306_v37, %s952_s16 }
 0x2a8   :  { %562 = vrot.lane.b32.xlu1 %v1320_v46, %s952_s16 }
 0x2fa   :  { %v529_v48 = vpop.permute.xlu0 %528  ;;  %v527_v49 = vpop.permute.xlu1 %526 }
 0x2fb   :  { %v1348_v50 = vsel %vm186_vm0, %v527_v49, %v529_v48 }
 0x2fc   :  { %v538_v51 = vsel %vm1039_vm1, %v1348_v50, 0.0 }
 0x2fd   :  { %594 = vrot.lane.b32.xlu0 %v538_v51, %s955_s20 }
 0x2fe   :  { %v531_v53 = vpop.permute.xlu1 %530  ;;  %v511_v59 = vpop.permute.xlu0 %510 }
 0x2ff   :  { %v1356_v54 = vsel %vm186_vm0, %v529_v48, %v531_v53 }
 0x300   :  { %v539_v55 = vsel %vm1043_vm2, %v1356_v54, 0.0 }
 0x301   :  { %600 = vrot.lane.b32.xlu1 %v539_v55, %s955_s20 }
 0x302   :  { %v533_v56 = vpop.permute.xlu1 %532  ;;  %v515_v45 = vpop.permute.xlu0 %514 }
 0x303   :  { %v1364_v57 = vsel %vm186_vm0, %v531_v53, %v533_v56  ;;  %v1368_v58 = vsel %vm186_vm0, %v533_v56, %v527_v49  ;;  %vm1573_vm0 = vcmp.lt.s32.totalorder %v1025_v5, 112 }
 0x304   :  { %v541_v62 = vsel %vm1078_vm5, %v1368_v58, 0.0  ;;  %v540_v63 = vsel %vm1074_vm4, %v1364_v57, 0.0  ;;  %vm1575_vm12 = vmmov %vm1573_vm0 }
 0x305   :  { %612 = vrot.lane.b32.xlu1 %v541_v62, %s955_s20  ;;  %606 = vrot.lane.b32.xlu0 %v540_v63, %s955_s20  ;;  %vm1576_vm13 = vmmov %vm1573_vm0 }
 0x306   :  { %v513_v4 = vpop.permute.xlu1 %512  ;;  %v593_v18 = vpop.permute.xlu0 %592  ;;  %vm1577_vm15 = vmmov %vm1573_vm0 }
 0x307   :  { %v1380_v6 = vsel %vm161_vm3, %v511_v59, %v513_v4  ;;  %v1402_v16 = vsel %vm161_vm3, %v513_v4, %v515_v45 }
 0x308   :  { %v523_v7 = vsel %vm1086_vm6, %v1380_v6, 0.0  ;;  %v524_v17 = vsel %vm1126_vm9, %v1402_v16, 0.0 }
 0x309   :  { %596 = vrot.lane.b32.xlu1 %v523_v7, %s955_s20 }
 0x30a   :  { %v517_v8 = vpop.permute.xlu1 %516  ;;  %v605_v22 = vpop.permute.xlu0 %604 }
 0x30b   :  { %v1388_v10 = vsel %vm161_vm3, %v515_v45, %v517_v8  ;;  %v1392_v11 = vsel %vm161_vm3, %v517_v8, %v511_v59  ;;  %vm1574_vm3 = vmmov %vm1573_vm0 }
 0x30c   :  { %v522_v12 = vsel %vm1098_vm7, %v1392_v11, 0.0  ;;  %v525_v15 = vsel %vm1113_vm8, %v1388_v10, 0.0 }
 0x30d   :  { %590 = vrot.lane.b32.xlu0 %v522_v12, %s955_s20  ;;  %608 = vrot.lane.b32.xlu1 %v525_v15, %s955_s20 }
 0x30e   :  { %v599_v21 = vpop.permute.xlu1 %598  ;;  %v1418_v28 = vpop.permute.xlu0 %544 }
 0x30f   :  { %v618_v24 = vsel %vm1577_vm15, %v599_v21, %v605_v22  ;;  %vm1581_vm15 = vmmov %vm1573_vm0 }
 0x311   :  { %602 = vrot.lane.b32.xlu0 %v524_v17, %s955_s20  ;;  %552 = vrot.lane.b32.xlu1 %v539_v55, %s952_s16 }
 0x312   :  { %v611_v27 = vpop.permute.xlu1 %610  ;;  %v557_v32 = vpop.permute.xlu0 %556 }
 0x313   :  { %v624_v29 = vsel %vm1573_vm0, %v611_v27, %v593_v18 }
 0x315   :  { %546 = vrot.lane.b32.xlu0 %v538_v51, %s952_s16  ;;  %564 = vrot.lane.b32.xlu1 %v541_v62, %s952_s16 }
 0x316   :  { %v1420_v31 = vpop.permute.xlu1 %550 }
 0x319   :  { %558 = vrot.lane.b32.xlu0 %v540_v63, %s952_s16  ;;  %548 = vrot.lane.b32.xlu1 %v523_v7, %s952_s16 }
 0x31a   :  { %v563_v34 = vpop.permute.xlu1 %562 }
 0x31d   :  { %542 = vrot.lane.b32.xlu0 %v522_v12, %s952_s16  ;;  %560 = vrot.lane.b32.xlu1 %v525_v15, %s952_s16 }
 0x321   :  { %554 = vrot.lane.b32.xlu0 %v524_v17, %s952_s16 }
 0x36f   :  { %v595_v35 = vpop.permute.xlu0 %594 }
 0x373   :  { %v601_v36 = vpop.permute.xlu1 %600 }
 0x374   :  { %v622_v23 = vsel %vm1576_vm13, %v595_v35, %v601_v36  ;;  %vm1580_vm13 = vmmov %vm1573_vm0 }
 0x377   :  { %v607_v19 = vpop.permute.xlu0 %606  ;;  %v613_v9 = vpop.permute.xlu1 %612 }
 0x378   :  { %v619_v3 = vsel %vm1573_vm0, %v601_v36, %v607_v19  ;;  %v616_v0 = vsel %vm1574_vm3, %v607_v19, %v613_v9  ;;  %v625_v20 = vsel %vm1575_vm12, %v613_v9, %v595_v35  ;;  %vm1578_vm3 = vmmov %vm1573_vm0 }
 0x379   :  { %866 = vmatprep.subr.msk.mxu0 %vm1161_vm10, %v619_v3  ;;  %877 = vmatprep.subr.msk.mxu1 %vm1165_vm11, %v625_v20  ;;  %v621_v40 = vsel %vm1578_vm3, %v593_v18, %v599_v21  ;;  %vm1579_vm12 = vmmov %vm1573_vm0 }
 0x37a   :  { %653 = vmatpush1.msra.mxu0 %v622_v23  ;;  %724 = vmatpush1.msra.mxu1 %v616_v0  ;;  %v615_v41 = vsel %vm1579_vm12, %v605_v22, %v611_v27  ;;  %vm1582_vm3 = vmmov %vm1573_vm0 }
 0x37b   :  { %867 = vmatprep.subr.msk.mxu0 %vm1161_vm10, %v618_v24  ;;  %878 = vmatprep.subr.msk.mxu1 %vm1165_vm11, %v624_v29  ;;  %v597_v44 = vpop.permute.xlu1 %596 }
 0x37c   :  { %655 = vmatpush1.msra.mxu0 %v621_v40  ;;  %726 = vmatpush1.msra.mxu1 %v615_v41 }
 0x37f   :  { %v591_v48 = vpop.permute.xlu0 %590  ;;  %v609_v49 = vpop.permute.xlu1 %608 }
 0x380   :  { %v623_v51 = vsel %vm1580_vm13, %v609_v49, %v591_v48  ;;  %v620_v62 = vsel %vm1582_vm3, %v591_v48, %v597_v44  ;;  %vm1594_vm13 = vcmask 588800  }
 0x381   :  { %879 = vmatprep.subr.msk.mxu1 %vm1165_vm11, %v623_v51  ;;  %vm1597_vm3 = vmmov %vm1594_vm13 }
 0x383   :  { %v603_v53 = vpop.permute.xlu0 %602  ;;  %v553_v55 = vpop.permute.xlu1 %552 }
 0x384   :  { %v614_v56 = vsel %vm1581_vm15, %v603_v53, %v609_v49  ;;  %v617_v59 = vsel %vm1573_vm0, %v597_v44, %v603_v53 }
 0x385   :  { %868 = vmatprep.subr.msk.mxu0 %vm1161_vm10, %v617_v59  ;;  %728 = vmatpush1.msra.mxu1 %v614_v56 }
 0x386   :  { %657 = vmatpush1.msra.mxu0 %v620_v62  ;;  %880 = vmatprep.subr.msk.mxu1 %vm1078_vm5, %v1368_v58 }
 0x387   :  { %v547_v61 = vpop.permute.xlu0 %546  ;;  %869 = vmatprep.subr.msk.mxu0 %vm1043_vm2, %v1356_v54  ;;  %881 = vmatpush1.msk.msra.mxu1 %vm1074_vm4, %v1364_v57  ;;  %v565_v63 = vpop.permute.xlu1 %564 }
 0x388   :  { %870 = vmatpush1.msk.msra.mxu0 %vm1039_vm1, %v1348_v50  ;;  %731 = vmatprep.subr.mxu1 %v1320_v46  ;;  %vm1583_vm1 = vcmp.lt.s32.totalorder %v1025_v5, 16 }
 0x389   :  { %660 = vmatprep.subr.mxu0 %v1306_v37  ;;  %732 = vmatpush1.msra.mxu1 %v1314_v43  ;;  %vm1584_vm2 = vmmov %vm1583_vm1 }
 0x38a   :  { %661 = vmatpush1.msra.mxu0 %v1308_v38  ;;  %882 = vmatprep.subr.msk.mxu1 %vm1113_vm8, %v1388_v10  ;;  %v574_v26 = vsel %vm1584_vm2, %v547_v61, %v553_v55  ;;  %vm1585_vm4 = vmmov %vm1583_vm1 }
 0x38b   :  { %v559_v14 = vpop.permute.xlu0 %558  ;;  %871 = vmatprep.subr.msk.mxu0 %vm1086_vm6, %v1380_v6  ;;  %883 = vmatpush1.msk.msra.mxu1 %vm1126_vm9, %v1402_v16  ;;  %v549_v13 = vpop.permute.xlu1 %548  ;;  %vm1586_vm5 = vmmov %vm1583_vm1  ;;  %vm1587_vm6 = vnez %v1572_v1 }
 0x38c   :  { %v571_v25 = vsel %vm1583_vm1, %v553_v55, %v559_v14  ;;  %872 = vmatpush1.msk.msra.mxu0 %vm1098_vm7, %v1392_v11  ;;  %v568_v39 = vsel %vm1585_vm4, %v559_v14, %v565_v63  ;;  %v577_v30 = vsel %vm1586_vm5, %v565_v63, %v547_v61  ;;  %vm1588_vm7 = vmmov %vm1583_vm1 }
 0x38d   :  { %664 = vmatprep.subr.mxu0 %v574_v26  ;;  %735 = vmatprep.subr.mxu1 %v568_v39  ;;  %v573_v33 = vsel %vm1588_vm7, %v1418_v28, %v1420_v31  ;;  %vm1589_vm8 = vmmov %vm1583_vm1 }
 0x38e   :  { %873 = vmatpush1.msk.msra.mxu0 %vm1233_vm14, %v577_v30  ;;  %884 = vmatpush1.msk.msra.mxu1 %vm1587_vm6, %v571_v25  ;;  %v567_v42 = vsel %vm1589_vm8, %v557_v32, %v563_v34  ;;  %vm1590_vm9 = vmmov %vm1583_vm1 }
 0x38f   :  { %v570_v60 = vsel %vm1590_vm9, %v1420_v31, %v557_v32  ;;  %vm1591_vm10 = vmmov %vm1583_vm1  ;;  %v543_v38 = vpop.permute.xlu0 %542  ;;  %666 = vmatprep.subr.mxu0 %v573_v33  ;;  %737 = vmatprep.subr.mxu1 %v567_v42  ;;  %v561_v43 = vpop.permute.xlu1 %560 }
 0x390   :  { %v576_v37 = vsel %vm1591_vm10, %v563_v34, %v1418_v28  ;;  %vm1592_vm11 = vmmov %vm1583_vm1  ;;  %885 = vmatpush1.msk.msra.mxu1 %vm1587_vm6, %v570_v60 }
 0x391   :  { %v575_v46 = vsel %vm1592_vm11, %v561_v43, %v543_v38  ;;  %874 = vmatpush1.msk.msra.mxu0 %vm1233_vm14, %v576_v37  ;;  %vm1593_vm12 = vmmov %vm1583_vm1 }
 0x392   :  { %v572_v50 = vsel %vm1593_vm12, %v543_v38, %v549_v13  ;;  %vm1595_vm15 = vmmov %vm1583_vm1 }
 0x393   :  { %668 = vmatprep.subr.mxu0 %v572_v50  ;;  %v555_v54 = vpop.permute.xlu0 %554  ;;  %vm1596_vm0 = vmmov %vm1583_vm1 }
 0x394   :  { %875 = vmatpush1.msk.msra.mxu0 %vm1233_vm14, %v575_v46  ;;  %v569_v57 = vsel %vm1595_vm15, %v549_v13, %v555_v54  ;;  %v566_v58 = vsel %vm1596_vm0, %v555_v54, %v561_v43 }
 0x395   :  { %876 = vmatmul.mubr.msk.f32.vlgmr.msra.gmra.mxu0 %vm1594_vm13, %v1282_v47  ;;  %739 = vmatprep.subr.mxu1 %v566_v58 }
 0x396   :  { %886 = vmatpush1.msk.msra.mxu1 %vm1587_vm6, %v569_v57 }
 0x397   :  { %887 = vmatmul.mubr.msk.f32.vlgmr.msra.gmra.mxu1 %vm1597_vm3, %v1282_v47 }
 0x455   :  { %v704_v4 = vpop.f32.mrf.mxu0 }
 0x456   :  { %v705_v6 = vadd.f32 %v704_v4, %v1300_v52 }
 0x457   :  { %v706_v2 = vpop.f32.mrf.mxu0  ;;  %v775_v45 = vpop.f32.mrf.mxu1 }
 0x458   :  { %v707_v7 = vadd.f32 %v706_v2, %v1300_v52  ;;  %v776_v5 = vadd.f32 %v775_v45, %v1300_v52  ;;  %v783_v1 = vmul.f32 %v705_v6, %v705_v6 }
 0x459   :  { %v777_v11 = vpop.f32.mrf.mxu1 }
 0x45a   :  { %v780_v8 = vadd.f32 %v707_v7, %v705_v6  ;;  %v784_v10 = vmul.f32 %v707_v7, %v707_v7  ;;  %v778_v12 = vadd.f32 %v777_v11, %v1300_v52  ;;  %v804_v47 = vmul.f32 %v776_v5, %v776_v5 }
 0x45c   :  { %781 = vadd.xlane.f32.xlu0 %v780_v8  ;;  %v785_v15 = vadd.f32 %v784_v10, %v783_v1  ;;  %v801_v16 = vadd.f32 %v778_v12, %v776_v5  ;;  %v805_v17 = vmul.f32 %v778_v12, %v778_v12 }
 0x45e   :  { %802 = vadd.xlane.f32.xlu1 %v801_v16  ;;  %v806_v18 = vadd.f32 %v805_v17, %v804_v47 }
 0x460   :  { %786 = vadd.xlane.f32.xlu0 %v785_v15 }
 0x464   :  { %807 = vadd.xlane.f32.xlu0 %v806_v18 }
 0x4e5   :  { %v782_v21 = vpop.xlane.xlu0 %781 }
 0x4e6   :  { %v788_v22 = vmul.f32 0.00390625, %v782_v21 }
 0x4e7   :  { %v803_v28 = vpop.xlane.xlu1 %802 }
 0x4e8   :  { %v790_v31 = vmul.f32 %v788_v22, %v788_v22  ;;  %v809_v34 = vmul.f32 0.00390625, %v803_v28  ;;  %v793_v24 = vsub.f32 %v705_v6, %v788_v22  ;;  %v794_v29 = vsub.f32 %v707_v7, %v788_v22 }
 0x4e9   :  { %v787_v27 = vpop.xlane.xlu0 %786 }
 0x4ea   :  { %v789_v32 = vmul.f32 0.00390625, %v787_v27  ;;  %v811_v9 = vmul.f32 %v809_v34, %v809_v34  ;;  %v814_v48 = vsub.f32 %v776_v5, %v809_v34  ;;  %v815_v49 = vsub.f32 %v778_v12, %v809_v34 }
 0x4ec   :  { %v791_v35 = vsub.f32 %v789_v32, %v790_v31 }
 0x4ed   :  { %v808_v36 = vpop.xlane.xlu0 %807 }
 0x4ee   :  { %v792_v52 = vmax.f32 %v791_v35, 0.0  ;;  %v810_v19 = vmul.f32 0.00390625, %v808_v36 }
 0x4f0   :  { %v795_v3 = vadd.f32 1e-05, %v792_v52  ;;  %v812_v0 = vsub.f32 %v810_v19, %v811_v9 }
 0x4f2   :  { %902 = vrsqrt.f32 %v795_v3  ;;  %v813_v20 = vmax.f32 %v812_v0, 0.0 }
 0x4f4   :  { %v816_v23 = vadd.f32 1e-05, %v813_v20 }
 0x4f6   :  { %904 = vrsqrt.f32 %v816_v23 }
 0x4ff   :  { %v903_v40 = vpop.eup %902 }
 0x500   :  { %v797_v41 = vmul.f32 %v903_v40, %v793_v24  ;;  %v798_v44 = vmul.f32 %v903_v40, %v794_v29 }
 0x502   :  { %v799_v51 = vmax.f32 %v797_v41, 0.0  ;;  %v800_v53 = vmax.f32 %v798_v44, 0.0 }
 0x503   :  { %v905_v55 = vpop.eup %904 }
 0x504   :  { %v818_v56 = vmul.f32 %v905_v55, %v814_v48  ;;  %v819_v59 = vmul.f32 %v905_v55, %v815_v49  ;;  %822 = vst [vmem:[#allocation5] sm:$0xff] %v799_v51  ;;  %823 = vst [vmem:[#allocation5 + $0x8] sm:$0xff] %v800_v53 }
 0x506   :  { %v820_v62 = vmax.f32 %v818_v56, 0.0  ;;  %v821_v61 = vmax.f32 %v819_v59, 0.0 }
 0x508   :  { %825 = vst [vmem:[#allocation5 + $0x10] sm:$0xff] %v820_v62  ;;  %826 = vst [vmem:[#allocation5 + $0x18] sm:$0xff] %v821_v61 }
 0x509   :  { %937 = shalt.err (!%p934_p9)
}
 0x50a   :  { %838 = dma.vmem_to_hbm [thread:$0]  %s833_s24, 512, %s1543_s3, [#allocation4], %s951_s15, %s951_s15, %s952_s16  }
 0x50b   :  { %948 = dma.done.wait [#allocation4], 512  }
 0x50c   :  { %949 = vsyncadd [#allocation4], 4294966784 }
 0x50d   :  { %842 = vsyncpa [#allocation3], 1 }
 0x50e   :  { %843 = vsyncpa [#allocation4], 1 }

</bundles_post_ra>
